<compile_context>
chip_gen: v7x
topology: tpu7x:2x2x1
jax: 0.10.0
libtpu: 0.0.40
codegen_flags: <defaults>
</compile_context>

<pallas_src>
import functools
import math

import jax
import jax.numpy as jnp
from jax.experimental import pallas as pl
from jax.experimental.pallas import tpu as pltpu


# ----------------------------- Pallas kernel -------------------------------

def _depatchify_matmul_kernel(w_ref, x_ref, o_ref):
    # w_ref: (M, C_in) resident weight;  x_ref: (C_in, TS);  o_ref: (M, TS)
    # TS (spatial tile) is the lane axis -> lane-dense loads and unmasked stores.
    o_ref[...] = jnp.dot(
        w_ref[...], x_ref[...], preferred_element_type=jnp.float32
    ).astype(o_ref.dtype)


def _pick_spatial_tile(s, m, c_in, itemsize, budget_bytes=8 * 1024 * 1024):
    """Largest lane-aligned spatial tile whose double-buffered blocks fit the budget."""
    # Per lane of tile: double-buffered input (c_in) + output (m) blocks, plus one
    # output-sized f32 temporary for the matmul result before the store.
    bytes_per_lane = (2 * (m + c_in) + m) * max(itemsize, 4)
    tile = budget_bytes // max(bytes_per_lane, 1)
    tile = max(128, min(8192, (tile // 128) * 128))
    # Small problems: take the whole (full-dim) spatial axis in one block.
    return s if s <= tile else tile


def _depatchify_matmul(wmat, x3, *, tile_s=None,
                       vmem_limit_bytes=32 * 1024 * 1024):
    """Y[b] = wmat @ x3[b]   with wmat (M, C_in), x3 (B, C_in, S)  ->  (B, M, S)."""
    m, c_in = wmat.shape
    b, c_in_x, s = x3.shape
    assert c_in == c_in_x
    if tile_s is None:
        tile_s = _pick_spatial_tile(s, m, c_in, x3.dtype.itemsize)

    # Ragged last spatial block is masked by Pallas: no explicit pad / slice passes.
    grid = (b, pl.cdiv(s, tile_s))

    return pl.pallas_call(
        _depatchify_matmul_kernel,
        out_shape=jax.ShapeDtypeStruct((b, m, s), x3.dtype),
        grid=grid,
        in_specs=[
            # Tiny weight block, identical for every grid step (stays resident).
            pl.BlockSpec((m, c_in), lambda bi, si: (0, 0)),
            # Native-layout input: (C_in, tile_s), big spatial axis on lanes.
            pl.BlockSpec((None, c_in, tile_s), lambda bi, si: (bi, 0, si)),
        ],
        out_specs=pl.BlockSpec((None, m, tile_s), lambda bi, si: (bi, 0, si)),
        compiler_params=pltpu.CompilerParams(
            dimension_semantics=("parallel", "parallel"),
            vmem_limit_bytes=vmem_limit_bytes,
        ),
    )(wmat, x3)


# ----------------------------- Module wrapper -------------------------------

def recovery_image_4d(x, weight, image_size, patch_size, *, tile_s=None):
    """JAX/Pallas equivalent of RecoveryImage4D.forward.

    x:      (B, C_in, l_i, d_i, h_i, w_i)
    weight: (C_in, C_out, l_k, d_k, h_k, w_k)   (ConvTranspose4d weight, bias=False)
    """
    B, c_in, l_i, d_i, h_i, w_i = x.shape
    c_in_w, c_out, l_k, d_k, h_k, w_k = weight.shape
    assert c_in == c_in_w
    assert (l_k, d_k, h_k, w_k) == tuple(patch_size)

    s = l_i * d_i * h_i * w_i
    m = c_out * l_k * d_k * h_k * w_k

    # Native layout: reshape only, no transpose (no extra HBM pass over x).
    x3 = x.reshape(B, c_in, s)
    # Tiny weight reorder: (C_in, C_out*K) -> (M, C_in) so the kernel output is Yᵀ
    # (lane axis = spatial).  Cast to x.dtype so bf16 inputs stay bf16 end-to-end.
    wmat = weight.reshape(c_in, m).T.astype(x.dtype)

    y = _depatchify_matmul(wmat, x3, tile_s=tile_s)          # (B, M, S), dtype x.dtype

    # De-interleave kernel offsets with the spatial grid, then crop.  XLA fuses this
    # reshape/transpose/slice chain into a single copy of the expanded output.
    # TODO(synk): fuse this de-interleave into the kernel's out_specs (grid over
    # (b, l, d) writing (C_out, Kl, Kd, Ho, Wo) blocks) to drop this last HBM pass.
    y = y.reshape(B, c_out, l_k, d_k, h_k, w_k, l_i, d_i, h_i, w_i)
    y = jnp.transpose(y, (0, 1, 6, 2, 7, 3, 8, 4, 9, 5))
    l_o, d_o, h_o, w_o = l_i * l_k, d_i * d_k, h_i * h_k, w_i * w_k
    y = y.reshape(B, c_out, l_o, d_o, h_o, w_o)

    # Cropping identical to RecoveryImage4D.forward: pl/depth paddings are computed
    # but never applied in the torch code (only height/width are cropped); no bias.
    pl_padding = l_o - image_size[0]          # noqa: F841  (semantic fidelity w/ torch)
    depth_padding = d_o - image_size[1]       # noqa: F841
    height_padding = h_o - image_size[2]
    width_padding = w_o - image_size[3]
    pad_top = height_padding // 2
    pad_bottom = height_padding - pad_top
    pad_left = width_padding // 2
    pad_right = width_padding - pad_left
    return y[:, :, :, :, pad_top:h_o - pad_bottom, pad_left:w_o - pad_right]


def init_weight(key, in_channels, out_channels, kernel_size):
    """Deterministic kaiming_uniform(a=sqrt(5))-style init, matching the torch shape
    (in_channels, out_channels, *kernel_size)."""
    shape = (in_channels, out_channels) + tuple(kernel_size)
    fan_in = out_channels * math.prod(kernel_size)   # torch fan_in for this layout
    gain = math.sqrt(2.0 / (1.0 + 5.0))              # kaiming gain with a = sqrt(5)
    bound = gain * math.sqrt(3.0 / fan_in)
    return jax.random.uniform(key, shape, jnp.float32, minval=-bound, maxval=bound)


# ------------------------------- Reference ----------------------------------

def _reference(x, weight, image_size):
    """Pure-JAX reference of the same forward for correctness checking."""
    B, c_in, L, D, H, W = x.shape
    _, c_out, Kl, Kd, Kh, Kw = weight.shape
    y = jnp.einsum('bcldhw,copqrs->bolpdqhrws', x, weight)
    y = y.reshape(B, c_out, L * Kl, D * Kd, H * Kh, W * Kw)
    h_o, w_o = H * Kh, W * Kw
    hp = h_o - image_size[2]
    wp = w_o - image_size[3]
    pt, pb = hp // 2, hp - hp // 2
    plf, prt = wp // 2, wp - wp // 2
    return y[:, :, :, :, pt:h_o - pb, plf:w_o - prt]


# --------------------------------- Main --------------------------------------

if __name__ == "__main__":
    key = jax.random.PRNGKey(0)
    k_x, k_w = jax.random.split(key)

    # Small, consistent shapes.
    B = 2
    in_channels = 8
    out_channels = 3
    patch_size = (1, 2, 4, 4)          # (Pl, Depth, Lat, Lon) patch
    image_size = (2, 4, 14, 14)        # target (Pl, Depth, Lat, Lon)
    l_i, d_i, h_i, w_i = 2, 2, 4, 4    # patch-embedded input spatial dims

    x = jax.random.normal(k_x, (B, in_channels, l_i, d_i, h_i, w_i), jnp.float32)
    weight = init_weight(k_w, in_channels, out_channels, patch_size)

    fwd = jax.jit(functools.partial(recovery_image_4d,
                                    image_size=image_size, patch_size=patch_size))
    out = jax.block_until_ready(fwd(x, weight))

    expected_shape = (B, out_channels, l_i * patch_size[0], d_i * patch_size[1],
                      image_size[2], image_size[3])
    assert out.shape == expected_shape, (out.shape, expected_shape)
    assert out.dtype == x.dtype, (out.dtype, x.dtype)

    ref = _reference(x, weight, image_size)
    assert jnp.allclose(out, ref, atol=2e-5, rtol=2e-5), "mismatch vs reference"

    print("KERNEL_OK")
</pallas_src>

<mosaic_0001>
module attributes {stable_mosaic.version = 11 : i64} {
  func.func @_depatchify_matmul_kernel(%arg0: i32, %arg1: i32, %arg2: memref<96x8xf32, #tpu.memory_space<vmem>>, %arg3: memref<1x8x64xf32, #tpu.memory_space<vmem>>, %arg4: memref<1x96x64xf32, #tpu.memory_space<vmem>>) attributes {dimension_semantics = [#tpu.dimension_semantics<parallel>, #tpu.dimension_semantics<parallel>], iteration_bounds = array<i64: 2, 1>, scalar_prefetch = 0 : i64, scratch_operands = 0 : i64, tpu.core_type = #tpu.core_type<tc>, window_params = [{pipeline_mode = #tpu.pipeline_mode<synchronous>, transform_indices = @transform_0, window_bounds = array<i64: 96, 8>}, {transform_indices = @transform_1, window_bounds = array<i64: 1, 8, 64>}, {transform_indices = @transform_2, window_bounds = array<i64: 1, 96, 64>}]} {
    %c0 = arith.constant 0 : index
    %c0_0 = arith.constant 0 : index
    %0 = vector.load %arg2[%c0, %c0_0] : memref<96x8xf32, #tpu.memory_space<vmem>>, vector<96x8xf32>
    %c0_1 = arith.constant 0 : index
    %c0_2 = arith.constant 0 : index
    %c0_3 = arith.constant 0 : index
    %1 = vector.load %arg3[%c0_1, %c0_2, %c0_3] : memref<1x8x64xf32, #tpu.memory_space<vmem>>, vector<1x8x64xf32>
    %2 = vector.shape_cast %1 : vector<1x8x64xf32> to vector<8x64xf32>
    %cst = arith.constant dense<0.000000e+00> : vector<96x64xf32>
    %3 = tpu.matmul %0, %2, %cst {dimension_numbers = #tpu.dot_dimension_numbers<[1], [0], [0], [1], [0, 0, 1, 1], [], []>} : vector<96x8xf32>, vector<8x64xf32>, vector<96x64xf32> -> vector<96x64xf32>
    %c0_4 = arith.constant 0 : index
    %c0_5 = arith.constant 0 : index
    %c0_6 = arith.constant 0 : index
    %4 = vector.load %arg4[%c0_4, %c0_5, %c0_6] : memref<1x96x64xf32, #tpu.memory_space<vmem>>, vector<1x96x64xf32>
    %5 = vector.shape_cast %4 : vector<1x96x64xf32> to vector<96x64xf32>
    %6 = vector.shape_cast %3 : vector<96x64xf32> to vector<1x96x64xf32>
    tpu.vector_store %arg4[%c0_4, %c0_5, %c0_6], %6 {strides = array<i32>} : memref<1x96x64xf32, #tpu.memory_space<vmem>>, vector<1x96x64xf32>,
    return
  }
  func.func @transform_0(%arg0: i32, %arg1: i32) -> (i32, i32) {
    %c0_i32 = arith.constant 0 : i32
    %c0_i32_0 = arith.constant 0 : i32
    %c0_i32_1 = arith.constant 0 : i32
    return %c0_i32, %c0_i32_0 : i32, i32
  }
  func.func @transform_1(%arg0: i32, %arg1: i32) -> (i32, i32, i32) {
    %c0_i32 = arith.constant 0 : i32
    %c0_i32_0 = arith.constant 0 : i32
    return %arg0, %c0_i32, %arg1 : i32, i32, i32
  }
  func.func @transform_2(%arg0: i32, %arg1: i32) -> (i32, i32, i32) {
    %c0_i32 = arith.constant 0 : i32
    %c0_i32_0 = arith.constant 0 : i32
    return %arg0, %c0_i32, %arg1 : i32, i32, i32
  }
}

</mosaic_0001>

<bundles_post_ra>
// kernel: recovery_image_4d.1
= control target key start
LH: loop header
LB: loop body
LE: loop exit
PB: predicated region body
PF: predicated region fallthrough
CT: control target
= control target key end

     0   :  { %7 = vsyncpa [#allocation3], 0  ;;  %s638_s9 = smov 0   ;;  %s640_s10 = smov 0   ;;  %s742_s0 = inlined_call_operand.hbm [shape: f32[96,8], index: 0, kind: input, shape index: {}]   ;;  %s743_s1 = inlined_call_operand.vmem [shape: f32[2,8,64], index: 1, kind: input, shape index: {}]   ;;  %s744_s2 = inlined_call_operand.vmem [shape: f32[2,96,64], index: 2, kind: output, shape index: {}]  }
   0x1   :  { %s642_s11 = smov 0  }
   0x2 LB: > { %s468_s12 = sadd.s32 4294967295, %s618_s11   ;;  %s25_s13 = sadd.s32 1, %s614_s10  ;;  %s618_s11 = sphi %s642_s11, %s13_s11   ;;  %s614_s10 = sphi %s640_s10, %s754_s10   ;;  %s610_s9 = sphi %s638_s9, %s753_s9  }
   0x3   : > { %p27_p0 = scmp.ge.s32.totalorder %s25_s13, 2  ;;  %p470_p1 = scmp.ge.s32.totalorder %s618_s11, 1 }
   0x4   : > { %p107_p2 = scmp.lt.s32.totalorder %s618_s11, 3  ;;  %p663_p4 = scmp.eq.s32.totalorder %s468_s12, 0 }
   0x5   : > { %s756_s13 = smov (%p27_p0, %s25_s13), 0  ;;  %s620_s16 = smov [#allocation2]  }
   0x6   : > { %p659_p3 = pnand %p470_p1, %p107_p2  ;;  %s119_s17 = sshll.u32 %s620_s16, 4  ;;  %s120_s17 = int_to_ptr.vmem [resolvable:$true] %s119_s17 }
   0x7   : > { %s749_s15 = scalar_select %p663_p4, 1, 0 }
   0x8   : > { %s748_s14 = scalar_select %p659_p3, 1, 0 }
   0x9   : > { %p531_p5 = pneg %p659_p3  ;;  %s564_s21 = scalar_lea.hbm %s742_s0, 1536 }
   0xa   : > { %p565_p7 = scmp.ne.s32.totalorder %s742_s0, %s564_s21  ;;  %p571_p11 = scmp.lt.u32.totalorder %s564_s21, %s742_s0 }
   0xb   : > { %p671_p6 = pnand %p663_p4, %p531_p5 }
   0xd   : > { %p566_p8 = pneg %p671_p6 }
   0xf   : > { %p567_p9 = pnand %p566_p8, %p565_p7 }
  0x11   : > { %p568_p10 = pneg %p567_p9 }
  0x13   : > { %p573_p12 = pnand %p571_p11, %p568_p10 }
  0x15   : > { %576 = shalt.err (!%p573_p12)
}
  0x16   : > { %s577_s26 = scalar_lea.vmem %s120_s17, 1536  ;;  %p585_p2 = scmp.lt.s32.totalorder %s120_s17, %s120_s17 }
  0x17   : > { %p578_p13 = scmp.ne.s32.totalorder %s120_s17, %s577_s26  ;;  %p586_p5 = scmp.lt.s32.totalorder %s577_s26, %s577_s26 }
  0x19   : > { %p580_p0 = pnand %p578_p13, %p566_p8  ;;  %p587_p4 = por %p586_p5, %p585_p2 }
  0x1b   : > { %p581_p1 = pneg %p580_p0 }
  0x1d   : > { %p588_p3 = pnand %p587_p4, %p581_p1 }
  0x1f   : > { %591 = shalt.err (!%p588_p3)
}
  0x20   : > { %s621_s27 = smov 128   ;;  %s622_s28 = smov 8  }
  0x21   : > { %534 = dma.hbm_to_vmem [thread:$0]  (!%p671_p6), %s742_s0, 1536, %s120_s17, [#allocation3], %s621_s27, %s621_s27, %s622_s28  }
  0x22   : > { %p751_p7 = scmp.ne.s32.totalorder %s748_s14, 0 }
  0x23   : > { %p752_p9 = scmp.ne.s32.totalorder (!%p751_p7), %s749_s15, 0 }
  0x24   : > { %145 = sbr.rel (%p751_p7) target bundleno = 274 (0x112), region = 28 }
  0x2b   : > { %605 = dma.done.wait (%p752_p9), [#allocation3], 1536  }
  0x2c   : > { %607 = vsyncadd (%p752_p9), [#allocation3], 4294965760  ;;  %p172_p3 = scmp.lt.s32.totalorder %s610_s9, 1  ;;  %v187_v1 = vld [vmem:[#allocation2] sm:$0xff]  ;;  %vm200_vm0 = vcmask 64512   ;;  %v193_v2 = vld [vmem:[#allocation2 + $0x30] sm:$0xff] }
  0x2d   : > { %v188_v3 = vld [vmem:[#allocation2 + $0x8] sm:$0xff]  ;;  %v194_v4 = vld [vmem:[#allocation2 + $0x38] sm:$0xff]  ;;  %v189_v5 = vld [vmem:[#allocation2 + $0x10] sm:$0xff]  ;;  %506 = vmatprep.mubr.msk.f32.mxu0 %vm200_vm0, %v187_v1  ;;  %515 = vmatprep.mubr.msk.f32.mxu1 %vm200_vm0, %v193_v2  ;;  %vm362_vm1 = vcmask 523264  }
  0x2e   : > { %s758_s9 = smov (!%p172_p3, %s610_s9), 1  ;;  %v195_v6 = vld [vmem:[#allocation2 + $0x40] sm:$0xff]  ;;  %v190_v7 = vld [vmem:[#allocation2 + $0x18] sm:$0xff]  ;;  %v196_v8 = vld [vmem:[#allocation2 + $0x48] sm:$0xff] }
  0x2f   : > { %s475_s3 = sshll.u32 %s758_s9, 3  ;;  %v191_v9 = vld [vmem:[#allocation2 + $0x20] sm:$0xff]  ;;  %v197_v10 = vld [vmem:[#allocation2 + $0x50] sm:$0xff]  ;;  %v192_v11 = vld [vmem:[#allocation2 + $0x28] sm:$0xff]  ;;  %s526_s7 = smul.u32 96, %s758_s9 }
  0x30   : > { %s178_s6 = scalar_lea.vmem %s743_s1, %s475_s3  ;;  %v198_v12 = vld [vmem:[#allocation2 + $0x58] sm:$0xff] }
  0x31   : > { %v199_v0 = vld [vmem:[%s178_s6] sm:$0xff]  ;;  %s186_s14 = scalar_lea.vmem %s744_s2, %s526_s7 }
  0x32   : > { %504 = vmatprep.subr.mxu0 %v199_v0  ;;  %524 = vmatprep.subr.mxu1 %v199_v0 }
  0x33   : > { %505 = vmatpush3.msra.mxu0 %v199_v0  ;;  %525 = vmatpush3.msra.mxu1 %v199_v0 }
  0x34   : > { %507 = vmatmul.mubr.msk.f32.vlgmr.msra.gmra.mrb[0].mxu0 %vm200_vm0, %v188_v3  ;;  %516 = vmatmul.mubr.msk.f32.vlgmr.msra.gmra.mrb[0].mxu1 %vm200_vm0, %v194_v4 }
  0x35   : > { %509 = vmatprep.mubr.msk.f32.mxu0 %vm200_vm0, %v189_v5  ;;  %518 = vmatprep.mubr.msk.f32.mxu1 %vm200_vm0, %v195_v6 }
  0x38   : > { %510 = vmatmul.mubr.msk.f32.gmra.mrb[2].mxu0 %vm200_vm0, %v190_v7  ;;  %519 = vmatmul.mubr.msk.f32.gmra.mrb[2].mxu1 %vm200_vm0, %v196_v8 }
  0x39   : > { %512 = vmatprep.mubr.msk.f32.mxu0 %vm200_vm0, %v191_v9  ;;  %521 = vmatprep.mubr.msk.f32.mxu1 %vm200_vm0, %v197_v10 }
  0x3c   : > { %513 = vmatmul.mubr.msk.f32.gmra.mrb[4].mxu0 %vm200_vm0, %v192_v11  ;;  %522 = vmatmul.mubr.msk.f32.gmra.mrb[4].mxu1 %vm200_vm0, %v198_v12 }
 0x107   : > { %v508_v13 = vpop.f32.mrb[0].mxu0  ;;  %v517_v14 = vpop.f32.mrb[0].mxu1 }
 0x108   : > { %364 = vst.msk [vmem:[%s186_s14 + $0x8] sm:$0xff] %vm362_vm1, %v508_v13  ;;  %370 = vst.msk [vmem:[%s186_s14 + $0x38] sm:$0xff] %vm362_vm1, %v517_v14  ;;  %v303_v15 = vpop.f32.mrb[1].mxu0  ;;  %v333_v16 = vpop.f32.mrb[1].mxu1 }
 0x109   : > { %363 = vst.msk [vmem:[%s186_s14] sm:$0xff] %vm362_vm1, %v303_v15  ;;  %369 = vst.msk [vmem:[%s186_s14 + $0x30] sm:$0xff] %vm362_vm1, %v333_v16 }
 0x10b   : > { %v511_v17 = vpop.f32.mrb[2].mxu0  ;;  %v520_v18 = vpop.f32.mrb[2].mxu1 }
 0x10c   : > { %366 = vst.msk [vmem:[%s186_s14 + $0x18] sm:$0xff] %vm362_vm1, %v511_v17  ;;  %372 = vst.msk [vmem:[%s186_s14 + $0x48] sm:$0xff] %vm362_vm1, %v520_v18  ;;  %v313_v19 = vpop.f32.mrb[3].mxu0  ;;  %v343_v20 = vpop.f32.mrb[3].mxu1 }
 0x10d   : > { %365 = vst.msk [vmem:[%s186_s14 + $0x10] sm:$0xff] %vm362_vm1, %v313_v19  ;;  %371 = vst.msk [vmem:[%s186_s14 + $0x40] sm:$0xff] %vm362_vm1, %v343_v20 }
 0x10f   : > { %v514_v21 = vpop.f32.mrb[4].mxu0  ;;  %v523_v22 = vpop.f32.mrb[4].mxu1 }
 0x110   : > { %368 = vst.msk [vmem:[%s186_s14 + $0x28] sm:$0xff] %vm362_vm1, %v514_v21  ;;  %374 = vst.msk [vmem:[%s186_s14 + $0x58] sm:$0xff] %vm362_vm1, %v523_v22  ;;  %v323_v23 = vpop.f32.mrb[5].mxu0  ;;  %v353_v24 = vpop.f32.mrb[5].mxu1 }
 0x111   : > { %367 = vst.msk [vmem:[%s186_s14 + $0x20] sm:$0xff] %vm362_vm1, %v323_v23  ;;  %373 = vst.msk [vmem:[%s186_s14 + $0x50] sm:$0xff] %vm362_vm1, %v353_v24 }
 0x112 PF: > { %s13_s11 = sadd.s32 1, %s618_s11   ;;  %s753_s9 = smov %s614_s10 }
 0x113   : > { %p10_p4 = scmp.ge.s32.totalorder %s13_s11, 4   ;;  %s754_s10 = smov %s756_s13 }
 0x115   :  { %12 = sbr.rel (!%p10_p4) target bundleno = 2 (0x2), region = 63 }
 0x11c   :  { %402 = vsyncpa [#allocation3], 1 }
 0x11d   :  { %404 = vsyncpa [#allocation3 + $0x1], 1 }

</bundles_post_ra>
